<compile_context>
chip_gen: v7x
topology: tpu7x:2x2x1
jax: 0.10.0
libtpu: 0.0.40
codegen_flags: <defaults>
</compile_context>

<pallas_src>
import math

import jax
import jax.numpy as jnp
from jax import lax
from jax.experimental import pallas as pl
from jax.experimental.pallas import tpu as pltpu


def _gelu_exact(x):
    # PyTorch nn.GELU() default: exact erf-based GELU (computed in f32).
    return 0.5 * x * (1.0 + lax.erf(x * (1.0 / math.sqrt(2.0))))


def _ffn_kernel(x_ref, w1_ref, b1_ref, w2_ref, b2_ref, o_ref, acc_ref):
    # Grid: (row tiles [parallel], hidden chunks [arbitrary, innermost reduction]).
    # x_ref:  (tm, dim)                    -- resident across the hidden axis
    # w1_ref: (dim, th)   b1_ref: (1, th)  -- hidden chunk (or full, if resident)
    # w2_ref: (th, dim)   b2_ref: (1, dim)
    # o_ref:  (tm, dim)                    -- written on the last hidden chunk
    # acc_ref:(tm, dim) f32 scratch accumulator
    h_idx = pl.program_id(1)

    @pl.when(h_idx == 0)
    def _init():
        acc_ref[...] = jnp.zeros_like(acc_ref)

    # x @ W1 chunk: operands stay in their native dtype (bf16 feeds the MXU at
    # full rate), f32 accumulation via preferred_element_type.
    h = jnp.dot(x_ref[...], w1_ref[...], preferred_element_type=jnp.float32)
    h = _gelu_exact(h + b1_ref[...].astype(jnp.float32))          # (tm, th), f32

    # (GELU'd hidden chunk) @ W2 row-chunk, accumulated into the f32 scratch.
    acc_ref[...] += jnp.dot(h.astype(w2_ref.dtype), w2_ref[...],
                            preferred_element_type=jnp.float32)

    @pl.when(h_idx == pl.num_programs(1) - 1)
    def _finalize():
        o_ref[...] = (acc_ref[...] + b2_ref[...].astype(jnp.float32)
                      ).astype(o_ref.dtype)


def _round_up(x, m):
    return ((x + m - 1) // m) * m


def _sublane_pack(itemsize):
    # Rows per packed vreg sublane group: 8 (32-bit), 16 (bf16), 32 (8-bit).
    return {1: 32, 2: 16}.get(itemsize, 8)


def _vmem_capacity_bytes():
    try:
        return int(pltpu.get_tpu_info().vmem_capacity_bytes)
    except Exception:
        return 64 * 1024 * 1024  # conservative: v7x per-TensorCore VMEM


def _choose_hidden_tiling(hidden, target):
    """Return (th, hidden_padded): th a multiple of 128 that divides hidden_padded."""
    target = max(128, (target // 128) * 128)
    hidden128 = _round_up(hidden, 128)
    if hidden128 <= target:
        return hidden128, hidden128
    # Largest multiple-of-128 divisor of hidden128 that is <= target.
    best, t = None, 128
    while t <= target:
        if hidden128 % t == 0:
            best = t
        t += 128
    if best is not None:
        return best, hidden128
    # No clean divisor: zero-pad hidden up to a multiple of target so the
    # reduction stays streamed (bounded VMEM) instead of going fully resident.
    return target, _round_up(hidden128, target)


_TM_CANDIDATES = (1024, 512, 384, 256, 128, 64, 32, 16, 8)


def _plan_tiles(M, dim, hidden, x_itemsize, w_itemsize, o_itemsize, budget):
    """Pick (tm, th, hidden_padded) so the double-buffered working set fits budget."""
    pack = max(_sublane_pack(x_itemsize), 8)
    m_cap = _round_up(max(M, 1), pack)

    def row_bytes(tm):
        # x (double-buffered) + out (double-buffered) + f32 accumulator scratch.
        return tm * dim * (2 * x_itemsize + 2 * o_itemsize + 4)

    def weight_bytes(th):
        # W1 chunk + W2 chunk (double-buffered) + biases.
        return 2 * (dim * th + th * dim) * w_itemsize + 2 * (th + dim) * 4

    def best_tm(th):
        wb = weight_bytes(th)
        for cand in _TM_CANDIDATES:
            if cand % pack:
                continue
            tm = min(cand, m_cap)
            if wb + row_bytes(tm) <= budget:
                return tm
        return None

    hidden128 = _round_up(hidden, 128)

    # 1) Fully-resident weights (DMA'd exactly once) when they leave room for a
    #    reasonable row tile.
    if weight_bytes(hidden128) <= 0.6 * budget:
        tm = best_tm(hidden128)
        if tm is not None and tm >= min(128, m_cap):
            return tm, hidden128, hidden128

    # 2) Streamed hidden reduction. tm dominates (it sets flops per weight byte
    #    re-streamed from HBM), so maximize tm first, then th.
    for cand in _TM_CANDIDATES:
        if cand % pack:
            continue
        tm = min(cand, m_cap)
        for th_target in (1024, 512, 256, 128):
            th_eff, hidden_p = _choose_hidden_tiling(hidden, th_target)
            if weight_bytes(th_eff) + row_bytes(tm) <= budget:
                return tm, th_eff, hidden_p
        if tm == m_cap and cand <= m_cap:
            break  # smaller candidates give the same tm

    # Last resort: minimal tiles.
    th_eff, hidden_p = _choose_hidden_tiling(hidden, 128)
    return max(8, pack), th_eff, hidden_p


def feed_forward(x, w1, b1, w2, b2, *, compute_dtype=None, _budget_bytes=None):
    """FeedForward: GELU(x @ W1 + b1) @ W2 + b2.  x: (B, N, dim) -> (B, N, dim).

    compute_dtype: optional dtype (e.g. jnp.bfloat16) to cast x/W1/W2 to before
    the matmuls (accumulation stays f32, output keeps x.dtype). f32 x f32 runs
    the MXU in slower multi-pass mode; bf16 is the native-rate path.
    _budget_bytes: testing hook to override the VMEM planning budget.
    """
    B, N, dim = x.shape
    hidden = w1.shape[1]
    out_dtype = x.dtype
    M = B * N
    x2d = x.reshape(M, dim)                       # metadata-only, no HBM copy

    if compute_dtype is not None:
        x2d = x2d.astype(compute_dtype)
        w1 = w1.astype(compute_dtype)
        w2 = w2.astype(compute_dtype)

    # VMEM budget: ~85% of the per-core capacity as the Mosaic scoped limit
    # (≈54 MiB on v7x's 64 MiB cores, ≈108 MiB on v5e/v6e), minus planning
    # headroom for internal scratch / semaphores.
    cap = _vmem_capacity_bytes()
    vmem_limit = int(cap * 0.85)
    budget = (_budget_bytes if _budget_bytes is not None
              else max(8 << 20, vmem_limit - (6 << 20)))

    tm, th, hidden_p = _plan_tiles(
        M, dim, hidden,
        jnp.dtype(x2d.dtype).itemsize, jnp.dtype(w1.dtype).itemsize,
        jnp.dtype(out_dtype).itemsize, budget)

    # Zero-pad the hidden dimension if needed (exact: padded hidden units produce
    # GELU(0) = 0 and multiply zero W2 rows, so they contribute nothing).
    if hidden_p != hidden:
        pad = hidden_p - hidden
        w1 = jnp.pad(w1, ((0, 0), (0, pad)))
        b1 = jnp.pad(b1, (0, pad))
        w2 = jnp.pad(w2, ((0, pad), (0, 0)))

    b1_2d = b1.reshape(1, hidden_p)
    b2_2d = b2.reshape(1, dim)

    grid = (pl.cdiv(M, tm), hidden_p // th)

    out2d = pl.pallas_call(
        _ffn_kernel,
        out_shape=jax.ShapeDtypeStruct((M, dim), out_dtype),
        grid_spec=pltpu.PrefetchScalarGridSpec(
            num_scalar_prefetch=0,
            grid=grid,
            in_specs=[
                pl.BlockSpec((tm, dim), lambda i, h: (i, 0)),    # x rows
                pl.BlockSpec((dim, th), lambda i, h: (0, h)),    # W1 chunk
                pl.BlockSpec((1, th), lambda i, h: (0, h)),      # b1 chunk
                pl.BlockSpec((th, dim), lambda i, h: (h, 0)),    # W2 chunk
                pl.BlockSpec((1, dim), lambda i, h: (0, 0)),     # b2
            ],
            out_specs=pl.BlockSpec((tm, dim), lambda i, h: (i, 0)),
            scratch_shapes=[pltpu.VMEM((tm, dim), jnp.float32)],
        ),
        compiler_params=pltpu.CompilerParams(
            dimension_semantics=("parallel", "arbitrary"),
            vmem_limit_bytes=vmem_limit,
        ),
    )(x2d, w1, b1_2d, w2, b2_2d)

    return out2d.reshape(B, N, dim)


def init_params(key, dim, hidden_dim, dtype=jnp.float32):
    """Deterministic init matching nn.Linear's default (uniform +/- 1/sqrt(fan_in))."""
    k1, k2, k3, k4 = jax.random.split(key, 4)
    bound1 = 1.0 / math.sqrt(dim)
    bound2 = 1.0 / math.sqrt(hidden_dim)
    # Stored as (in, out) so the kernel can do x @ W directly.
    w1 = jax.random.uniform(k1, (dim, hidden_dim), dtype, -bound1, bound1)
    b1 = jax.random.uniform(k2, (hidden_dim,), dtype, -bound1, bound1)
    w2 = jax.random.uniform(k3, (hidden_dim, dim), dtype, -bound2, bound2)
    b2 = jax.random.uniform(k4, (dim,), dtype, -bound2, bound2)
    return w1, b1, w2, b2


def feed_forward_ref(x, w1, b1, w2, b2):
    xf = x.astype(jnp.float32)
    h = xf @ w1.astype(jnp.float32) + b1.astype(jnp.float32)
    h = 0.5 * h * (1.0 + lax.erf(h / math.sqrt(2.0)))
    return (h @ w2.astype(jnp.float32) + b2.astype(jnp.float32)).astype(x.dtype)


if __name__ == "__main__":
    key = jax.random.PRNGKey(0)
    kx, kp, kx2, kp2 = jax.random.split(key, 4)

    # Test 1: f32, weight-resident path (W1/W2 fit VMEM -> DMA'd exactly once).
    B, N, dim, hidden = 2, 8, 128, 1024
    x = jax.random.normal(kx, (B, N, dim), jnp.float32)
    w1, b1, w2, b2 = init_params(kp, dim, hidden)

    out = jax.block_until_ready(feed_forward(x, w1, b1, w2, b2))
    ref = feed_forward_ref(x, w1, b1, w2, b2)
    assert out.shape == (B, N, dim)
    assert jnp.allclose(out, ref, atol=1e-4, rtol=1e-4), "mismatch (resident path)"

    # Test 2: same problem, tiny planning budget to force the streamed hidden
    # reduction (multiple hidden chunks + f32 accumulator init/finalize).
    out_s = jax.block_until_ready(
        feed_forward(x, w1, b1, w2, b2, _budget_bytes=2 * 1024 * 1024))
    assert jnp.allclose(out_s, ref, atol=1e-4, rtol=1e-4), "mismatch (streamed path)"

    # Test 3: bf16 compute path (native-rate MXU), ragged row count (M=26) and an
    # odd hidden size (1000) exercising the zero-padding of the hidden dimension.
    B2, N2, dim2, hidden2 = 2, 13, 128, 1000
    x2 = jax.random.normal(kx2, (B2, N2, dim2), jnp.float32)
    w1b, b1b, w2b, b2b = init_params(kp2, dim2, hidden2)

    out_b = jax.block_until_ready(
        feed_forward(x2, w1b, b1b, w2b, b2b, compute_dtype=jnp.bfloat16))
    ref_b = feed_forward_ref(
        x2.astype(jnp.bfloat16).astype(jnp.float32),
        w1b.astype(jnp.bfloat16).astype(jnp.float32), b1b,
        w2b.astype(jnp.bfloat16).astype(jnp.float32), b2b)
    assert out_b.shape == (B2, N2, dim2)
    assert jnp.allclose(out_b, ref_b, atol=5e-2, rtol=5e-2), "mismatch (bf16 path)"

    print("KERNEL_OK")
</pallas_src>

<mosaic_0001>
module attributes {stable_mosaic.version = 11 : i64} {
  func.func @_ffn_kernel(%arg0: i32, %arg1: i32, %arg2: memref<16x128xf32, #tpu.memory_space<vmem>>, %arg3: memref<128x1024xf32, #tpu.memory_space<vmem>>, %arg4: memref<1x1024xf32, #tpu.memory_space<vmem>>, %arg5: memref<1024x128xf32, #tpu.memory_space<vmem>>, %arg6: memref<1x128xf32, #tpu.memory_space<vmem>>, %arg7: memref<16x128xf32, #tpu.memory_space<vmem>>, %arg8: memref<16x128xf32, #tpu.memory_space<vmem>>) attributes {dimension_semantics = [#tpu.dimension_semantics<parallel>, #tpu.dimension_semantics<arbitrary>], iteration_bounds = array<i64: 1, 1>, scalar_prefetch = 0 : i64, scratch_operands = 1 : i64, tpu.core_type = #tpu.core_type<tc>, window_params = [{transform_indices = @transform_0, window_bounds = array<i64: 16, 128>}, {transform_indices = @transform_1, window_bounds = array<i64: 128, 1024>}, {transform_indices = @transform_2, window_bounds = array<i64: 1, 1024>}, {transform_indices = @transform_3, window_bounds = array<i64: 1024, 128>}, {pipeline_mode = #tpu.pipeline_mode<synchronous>, transform_indices = @transform_4, window_bounds = array<i64: 1, 128>}, {transform_indices = @transform_5, window_bounds = array<i64: 16, 128>}]} {
    %c0_i32 = arith.constant 0 : i32
    %0 = arith.cmpi eq, %arg1, %c0_i32 : i32
    %1 = arith.extui %0 : i1 to i32
    %c0_i32_0 = arith.constant 0 : i32
    %2 = arith.cmpi ne, %1, %c0_i32_0 : i32
    scf.if %2 {
      %cst_18 = arith.constant 0.000000e+00 : f32
      %25 = vector.broadcast %cst_18 : f32 to vector<16x128xf32>
      %c0_19 = arith.constant 0 : index
      %c0_20 = arith.constant 0 : index
      %26 = vector.load %arg8[%c0_19, %c0_20] : memref<16x128xf32, #tpu.memory_space<vmem>>, vector<16x128xf32>
      tpu.vector_store %arg8[%c0_19, %c0_20], %25 {strides = array<i32>} : memref<16x128xf32, #tpu.memory_space<vmem>>, vector<16x128xf32>,
    } else {
    }
    %c0 = arith.constant 0 : index
    %c0_1 = arith.constant 0 : index
    %3 = vector.load %arg2[%c0, %c0_1] : memref<16x128xf32, #tpu.memory_space<vmem>>, vector<16x128xf32>
    %c0_2 = arith.constant 0 : index
    %c0_3 = arith.constant 0 : index
    %4 = vector.load %arg3[%c0_2, %c0_3] : memref<128x1024xf32, #tpu.memory_space<vmem>>, vector<128x1024xf32>
    %cst = arith.constant dense<0.000000e+00> : vector<16x1024xf32>
    %5 = tpu.matmul %3, %4, %cst {dimension_numbers = #tpu.dot_dimension_numbers<[1], [0], [0], [1], [0, 0, 1, 1], [], []>} : vector<16x128xf32>, vector<128x1024xf32>, vector<16x1024xf32> -> vector<16x1024xf32>
    %c0_4 = arith.constant 0 : index
    %c0_5 = arith.constant 0 : index
    %6 = vector.load %arg4[%c0_4, %c0_5] : memref<1x1024xf32, #tpu.memory_space<vmem>>, vector<1x1024xf32>
    %7 = vector.broadcast %6 : vector<1x1024xf32> to vector<16x1024xf32>
    %8 = arith.addf %5, %7 : vector<16x1024xf32>
    %cst_6 = arith.constant 5.000000e-01 : f32
    %9 = vector.broadcast %cst_6 : f32 to vector<16x1024xf32>
    %10 = arith.mulf %9, %8 : vector<16x1024xf32>
    %cst_7 = arith.constant 0.707106769 : f32
    %11 = vector.broadcast %cst_7 : f32 to vector<16x1024xf32>
    %12 = arith.mulf %8, %11 : vector<16x1024xf32>
    %13 = math.erf %12 : vector<16x1024xf32>
    %cst_8 = arith.constant 1.000000e+00 : f32
    %14 = vector.broadcast %cst_8 : f32 to vector<16x1024xf32>
    %15 = arith.addf %14, %13 : vector<16x1024xf32>
    %16 = arith.mulf %10, %15 : vector<16x1024xf32>
    %c0_9 = arith.constant 0 : index
    %c0_10 = arith.constant 0 : index
    %17 = vector.load %arg8[%c0_9, %c0_10] : memref<16x128xf32, #tpu.memory_space<vmem>>, vector<16x128xf32>
    %c0_11 = arith.constant 0 : index
    %c0_12 = arith.constant 0 : index
    %18 = vector.load %arg5[%c0_11, %c0_12] : memref<1024x128xf32, #tpu.memory_space<vmem>>, vector<1024x128xf32>
    %cst_13 = arith.constant dense<0.000000e+00> : vector<16x128xf32>
    %19 = tpu.matmul %16, %18, %cst_13 {dimension_numbers = #tpu.dot_dimension_numbers<[1], [0], [0], [1], [0, 0, 1, 1], [], []>} : vector<16x1024xf32>, vector<1024x128xf32>, vector<16x128xf32> -> vector<16x128xf32>
    %20 = arith.addf %17, %19 : vector<16x128xf32>
    %c0_14 = arith.constant 0 : index
    %c0_15 = arith.constant 0 : index
    %21 = vector.load %arg8[%c0_14, %c0_15] : memref<16x128xf32, #tpu.memory_space<vmem>>, vector<16x128xf32>
    tpu.vector_store %arg8[%c0_14, %c0_15], %20 {strides = array<i32>} : memref<16x128xf32, #tpu.memory_space<vmem>>, vector<16x128xf32>,
    %c0_i32_16 = arith.constant 0 : i32
    %22 = arith.cmpi eq, %arg1, %c0_i32_16 : i32
    %23 = arith.extui %22 : i1 to i32
    %c0_i32_17 = arith.constant 0 : i32
    %24 = arith.cmpi ne, %23, %c0_i32_17 : i32
    scf.if %24 {
      %c0_18 = arith.constant 0 : index
      %c0_19 = arith.constant 0 : index
      %25 = vector.load %arg8[%c0_18, %c0_19] : memref<16x128xf32, #tpu.memory_space<vmem>>, vector<16x128xf32>
      %c0_20 = arith.constant 0 : index
      %c0_21 = arith.constant 0 : index
      %26 = vector.load %arg6[%c0_20, %c0_21] : memref<1x128xf32, #tpu.memory_space<vmem>>, vector<1x128xf32>
      %27 = vector.broadcast %26 : vector<1x128xf32> to vector<16x128xf32>
      %28 = arith.addf %25, %27 : vector<16x128xf32>
      %c0_22 = arith.constant 0 : index
      %c0_23 = arith.constant 0 : index
      %29 = vector.load %arg7[%c0_22, %c0_23] : memref<16x128xf32, #tpu.memory_space<vmem>>, vector<16x128xf32>
      tpu.vector_store %arg7[%c0_22, %c0_23], %28 {strides = array<i32>} : memref<16x128xf32, #tpu.memory_space<vmem>>, vector<16x128xf32>,
    } else {
    }
    return
  }
  func.func @transform_0(%arg0: i32, %arg1: i32) -> (i32, i32) {
    %c0_i32 = arith.constant 0 : i32
    %c0_i32_0 = arith.constant 0 : i32
    return %arg0, %c0_i32 : i32, i32
  }
  func.func @transform_1(%arg0: i32, %arg1: i32) -> (i32, i32) {
    %c0_i32 = arith.constant 0 : i32
    %c0_i32_0 = arith.constant 0 : i32
    return %c0_i32, %arg1 : i32, i32
  }
  func.func @transform_2(%arg0: i32, %arg1: i32) -> (i32, i32) {
    %c0_i32 = arith.constant 0 : i32
    %c0_i32_0 = arith.constant 0 : i32
    return %c0_i32, %arg1 : i32, i32
  }
  func.func @transform_3(%arg0: i32, %arg1: i32) -> (i32, i32) {
    %c0_i32 = arith.constant 0 : i32
    %c0_i32_0 = arith.constant 0 : i32
    return %arg1, %c0_i32 : i32, i32
  }
  func.func @transform_4(%arg0: i32, %arg1: i32) -> (i32, i32) {
    %c0_i32 = arith.constant 0 : i32
    %c0_i32_0 = arith.constant 0 : i32
    %c0_i32_1 = arith.constant 0 : i32
    return %c0_i32, %c0_i32_0 : i32, i32
  }
  func.func @transform_5(%arg0: i32, %arg1: i32) -> (i32, i32) {
    %c0_i32 = arith.constant 0 : i32
    %c0_i32_0 = arith.constant 0 : i32
    return %arg0, %c0_i32 : i32, i32
  }
}

</mosaic_0001>

<bundles_post_ra>
// kernel: tpu_custom_call.1
= control target key start
LH: loop header
LB: loop body
LE: loop exit
PB: predicated region body
PF: predicated region fallthrough
CT: control target
= control target key end

     0   :  { %10 = vsyncpa [#allocation4], 0  ;;  %s1869_s0 = inlined_call_operand.hbm [shape: f32[16,128], index: 0, kind: input, shape index: {}]   ;;  %s1870_s1 = inlined_call_operand.hbm [shape: f32[128,1024], index: 1, kind: input, shape index: {}]   ;;  %s1871_s2 = inlined_call_operand.hbm [shape: f32[1,1024], index: 2, kind: input, shape index: {}]   ;;  %s1872_s3 = inlined_call_operand.hbm [shape: f32[1024,128], index: 3, kind: input, shape index: {}]   ;;  %s1873_s4 = inlined_call_operand.vmem [shape: f32[1,128], index: 4, kind: input, shape index: {}]   ;;  %s1874_s5 = inlined_call_operand.hbm [shape: f32[16,128], index: 5, kind: output, shape index: {}]  }
   0x1   :  { %11 = vsyncpa [#allocation7], 0 }
   0x2   :  { %12 = vsyncpa [#allocation10], 0 }
   0x3   :  { %13 = vsyncpa [#allocation5], 0  ;;  %s1678_s18 = smov [#allocation6]   ;;  %s1560_s22 = scalar_lea.hbm %s1870_s1, 16384 }
   0x4   :  { %s31_s19 = sshll.u32 %s1678_s18, 4  ;;  %p1561_p0 = scmp.ne.s32.totalorder %s1870_s1, %s1560_s22  ;;  %s32_s19 = int_to_ptr.vmem [resolvable:$true] %s31_s19 }
   0x5   :  { %p1564_p1 = scmp.lt.u32.totalorder %s1560_s22, %s1870_s1 }
   0x7   :  { %p1566_p2 = pnand %p1564_p1, %p1561_p0 }
   0x9   :  { %1569 = shalt.err (!%p1566_p2)
}
   0xa   :  { %s1570_s27 = scalar_lea.vmem %s32_s19, 16384  ;;  %p1575_p4 = scmp.lt.s32.totalorder %s32_s19, %s32_s19 }
   0xb   :  { %p1571_p3 = scmp.ne.s32.totalorder %s32_s19, %s1570_s27  ;;  %p1576_p5 = scmp.lt.s32.totalorder %s1570_s27, %s1570_s27 }
   0xd   :  { %p1577_p6 = por %p1576_p5, %p1575_p4 }
   0xf   :  { %p1578_p7 = pnand %p1577_p6, %p1571_p3 }
  0x11   :  { %1581 = shalt.err (!%p1578_p7)
}
  0x12   :  { %s1679_s28 = smov 1024   ;;  %s1680_s29 = smov 64  }
  0x13   :  { %37 = dma.hbm_to_vmem [thread:$0]  %s1870_s1, 16384, %s32_s19, [#allocation7], %s1679_s28, %s1679_s28, %s1680_s29  }
  0x14   :  { %s1681_s7 = smov [#allocation3]   ;;  %s1582_s11 = scalar_lea.hbm %s1869_s0, 256 }
  0x15   :  { %s19_s8 = sshll.u32 %s1681_s7, 4  ;;  %p1583_p8 = scmp.ne.s32.totalorder %s1869_s0, %s1582_s11  ;;  %s20_s8 = int_to_ptr.vmem [resolvable:$true] %s19_s8 }
  0x16   :  { %p1586_p9 = scmp.lt.u32.totalorder %s1582_s11, %s1869_s0 }
  0x18   :  { %p1588_p10 = pnand %p1586_p9, %p1583_p8 }
  0x1a   :  { %1591 = shalt.err (!%p1588_p10)
}
  0x1b   :  { %s1592_s16 = scalar_lea.vmem %s20_s8, 256  ;;  %p1597_p12 = scmp.lt.s32.totalorder %s20_s8, %s20_s8 }
  0x1c   :  { %p1593_p11 = scmp.ne.s32.totalorder %s20_s8, %s1592_s16  ;;  %p1598_p13 = scmp.lt.s32.totalorder %s1592_s16, %s1592_s16 }
  0x1e   :  { %p1599_p0 = por %p1598_p13, %p1597_p12 }
  0x20   :  { %p1600_p1 = pnand %p1599_p0, %p1593_p11 }
  0x22   :  { %1603 = shalt.err (!%p1600_p1)
}
  0x23   :  { %s1682_s1 = smov 128   ;;  %s1683_s17 = smov 8  }
  0x24   :  { %25 = dma.hbm_to_vmem [thread:$0]  %s1869_s0, 256, %s20_s8, [#allocation4], %s1682_s1, %s1682_s1, %s1683_s17  }
  0x25   :  { %s1684_s20 = smov [#allocation8]   ;;  %s1685_s22 = smov [#allocation9]  }
  0x26   :  { %s44_s21 = sshll.u32 %s1684_s20, 4  ;;  %s53_s23 = sshll.u32 %s1685_s22, 4  ;;  %s45_s21 = int_to_ptr.vmem [resolvable:$true] %s44_s21  ;;  %s1745_s23 = int_to_ptr.vmem [resolvable:$true] %s53_s23 }
  0x27   :  { %s1604_s26 = scalar_lea.hbm %s1871_s2, 128 }
  0x28   :  { %p1605_p2 = scmp.ne.s32.totalorder %s1871_s2, %s1604_s26  ;;  %p1608_p3 = scmp.lt.u32.totalorder %s1604_s26, %s1871_s2 }
  0x2a   :  { %p1610_p4 = pnand %p1608_p3, %p1605_p2 }
  0x2c   :  { %1613 = shalt.err (!%p1610_p4)
}
  0x2d   :  { %s1614_s0 = scalar_lea.vmem %s45_s21, 128  ;;  %p1619_p6 = scmp.lt.s32.totalorder %s45_s21, %s45_s21 }
  0x2e   :  { %p1615_p5 = scmp.ne.s32.totalorder %s45_s21, %s1614_s0  ;;  %p1620_p7 = scmp.lt.s32.totalorder %s1614_s0, %s1614_s0 }
  0x30   :  { %p1621_p8 = por %p1620_p7, %p1619_p6 }
  0x32   :  { %p1622_p9 = pnand %p1621_p8, %p1615_p5 }
  0x34   :  { %1625 = shalt.err (!%p1622_p9)
}
  0x35   :  { %47 = dma.hbm_to_vmem [thread:$0]  %s1871_s2, 128, %s45_s21, [#allocation7]  }
  0x36   :  { %s1626_s10 = scalar_lea.hbm %s1872_s3, 16384 }
  0x37   :  { %p1627_p10 = scmp.ne.s32.totalorder %s1872_s3, %s1626_s10  ;;  %p1630_p11 = scmp.lt.u32.totalorder %s1626_s10, %s1872_s3 }
  0x39   :  { %p1632_p12 = pnand %p1630_p11, %p1627_p10 }
  0x3b   :  { %1635 = shalt.err (!%p1632_p12)
}
  0x3c   :  { %s1636_s15 = scalar_lea.vmem %s1745_s23, 16384  ;;  %p1641_p0 = scmp.lt.s32.totalorder %s1745_s23, %s1745_s23 }
  0x3d   :  { %p1637_p13 = scmp.ne.s32.totalorder %s1745_s23, %s1636_s15  ;;  %p1642_p1 = scmp.lt.s32.totalorder %s1636_s15, %s1636_s15 }
  0x3f   :  { %p1643_p2 = por %p1642_p1, %p1641_p0 }
  0x41   :  { %p1644_p3 = pnand %p1643_p2, %p1637_p13 }
  0x43   :  { %1647 = shalt.err (!%p1644_p3)
}
  0x44   :  { %59 = dma.hbm_to_vmem [thread:$0]  %s1872_s3, 16384, %s1745_s23, [#allocation10], %s1682_s1, %s1682_s1, %s1683_s17  }
  0x45   :  { %1670 = dma.done.wait [#allocation4], 256  }
  0x46   :  { %1671 = vsyncadd [#allocation4], 4294967040 }
  0x47   :  { %1672 = dma.done.wait [#allocation7], 16512  }
  0x48   :  { %1673 = vsyncadd [#allocation7], 4294950784 }
  0x49   :  { %1674 = dma.done.wait [#allocation10], 16384  }
  0x4a   :  { %1675 = vsyncadd [#allocation10], 4294950912  ;;  %v1686_v0 = vmov 0.0   ;;  %v83_v1 = vld [vmem:[#allocation6 + $0x8] sm:$0xff]  ;;  %v85_v3 = vld [vmem:[#allocation6 + $0x18] sm:$0xff]  ;;  %s1687_s19 = smov [#allocation11]  }
  0x4b   :  { %316 = vmatprep.mubr.f32.mxu0 %v1686_v0  ;;  %393 = vmatprep.mubr.f32.mxu1 %v1686_v0  ;;  %v91_v2 = vld [vmem:[#allocation6 + $0x48] sm:$0xff]  ;;  %v93_v5 = vld [vmem:[#allocation6 + $0x58] sm:$0xff]  ;;  %v82_v6 = vld [vmem:[#allocation6] sm:$0xff]  ;;  %s1095_s20 = sshll.u32 %s1687_s19, 4  ;;  %s1096_s20 = int_to_ptr.vmem [resolvable:$true] %s1095_s20 }
  0x4c   :  { %v1262_v4 = vpack.c.bf16 %v91_v2, %v83_v1  ;;  %v90_v7 = vld [vmem:[#allocation6 + $0x40] sm:$0xff]  ;;  %v1294_v8 = vpack.c.bf16 %v93_v5, %v85_v3  ;;  %v84_v10 = vld [vmem:[#allocation6 + $0x10] sm:$0xff]  ;;  %v99_v12 = vld [vmem:[#allocation6 + $0x88] sm:$0xff]  ;;  %s1648_s21 = scalar_lea.vmem %s1096_s20, 256  ;;  %p1653_p5 = scmp.lt.s32.totalorder %s1096_s20, %s1096_s20 }
  0x4d   :  { %v1264_v9 = vpack.c.bf16 %v90_v7, %v82_v6  ;;  %v92_v11 = vld [vmem:[#allocation6 + $0x50] sm:$0xff]  ;;  %v107_v14 = vld [vmem:[#allocation6 + $0xc8] sm:$0xff]  ;;  %v101_v15 = vld [vmem:[#allocation6 + $0x98] sm:$0xff]  ;;  %p1649_p4 = scmp.ne.s32.totalorder %s1096_s20, %s1648_s21  ;;  %p1654_p6 = scmp.lt.s32.totalorder %s1648_s21, %s1648_s21 }
  0x4e   :  { %1263 = vmatprep.subr.bf16.mxu0 %v1262_v4  ;;  %v1296_v13 = vpack.c.bf16 %v92_v11, %v84_v10  ;;  %v109_v16 = vld [vmem:[#allocation6 + $0xd8] sm:$0xff]  ;;  %1295 = vmatprep.subr.bf16.mxu1 %v1294_v8  ;;  %v1266_v17 = vpack.c.bf16 %v107_v14, %v99_v12  ;;  %v98_v19 = vld [vmem:[#allocation6 + $0x80] sm:$0xff]  ;;  %v100_v21 = vld [vmem:[#allocation6 + $0x90] sm:$0xff] }
  0x4f   :  { %1265 = vmatpush1.bf16.msra.mxu0 %v1264_v9  ;;  %v1298_v18 = vpack.c.bf16 %v109_v16, %v101_v15  ;;  %v106_v20 = vld [vmem:[#allocation6 + $0xc0] sm:$0xff]  ;;  %v108_v23 = vld [vmem:[#allocation6 + $0xd0] sm:$0xff]  ;;  %v115_v24 = vld [vmem:[#allocation6 + $0x108] sm:$0xff]  ;;  %p1655_p7 = por %p1654_p6, %p1653_p5 }
  0x50   :  { %1297 = vmatpush1.bf16.msra.mxu1 %v1296_v13  ;;  %v1268_v22 = vpack.c.bf16 %v106_v20, %v98_v19  ;;  %v123_v25 = vld [vmem:[#allocation6 + $0x148] sm:$0xff]  ;;  %1267 = vmatprep.subr.bf16.mxu0 %v1266_v17  ;;  %v1300_v26 = vpack.c.bf16 %v108_v23, %v100_v21  ;;  %v117_v28 = vld [vmem:[#allocation6 + $0x118] sm:$0xff]  ;;  %v114_v30 = vld [vmem:[#allocation6 + $0x100] sm:$0xff] }
  0x51   :  { %1299 = vmatprep.subr.bf16.mxu1 %v1298_v18  ;;  %v1270_v27 = vpack.c.bf16 %v123_v25, %v115_v24  ;;  %v125_v29 = vld [vmem:[#allocation6 + $0x158] sm:$0xff]  ;;  %v122_v32 = vld [vmem:[#allocation6 + $0x140] sm:$0xff]  ;;  %v116_v33 = vld [vmem:[#allocation6 + $0x110] sm:$0xff]  ;;  %p1656_p8 = pnand %p1655_p7, %p1649_p4 }
  0x52   :  { %v1302_v31 = vpack.c.bf16 %v125_v29, %v117_v28  ;;  %v124_v34 = vld [vmem:[#allocation6 + $0x150] sm:$0xff]  ;;  %v1272_v35 = vpack.c.bf16 %v122_v32, %v114_v30  ;;  %v131_v36 = vld [vmem:[#allocation6 + $0x188] sm:$0xff]  ;;  %v133_v38 = vld [vmem:[#allocation6 + $0x198] sm:$0xff] }
  0x53   :  { %1269 = vmatpush1.bf16.msra.mxu0 %v1268_v22  ;;  %v139_v37 = vld [vmem:[#allocation6 + $0x1c8] sm:$0xff]  ;;  %v1304_v39 = vpack.c.bf16 %v124_v34, %v116_v33  ;;  %v141_v41 = vld [vmem:[#allocation6 + $0x1d8] sm:$0xff]  ;;  %v130_v42 = vld [vmem:[#allocation6 + $0x180] sm:$0xff] }
  0x54   :  { %1301 = vmatpush1.bf16.msra.mxu1 %v1300_v26  ;;  %1271 = vmatprep.subr.bf16.mxu0 %v1270_v27  ;;  %v1274_v40 = vpack.c.bf16 %v139_v37, %v131_v36  ;;  %v138_v43 = vld [vmem:[#allocation6 + $0x1c0] sm:$0xff]  ;;  %v1306_v44 = vpack.c.bf16 %v141_v41, %v133_v38  ;;  %v132_v45 = vld [vmem:[#allocation6 + $0x190] sm:$0xff]  ;;  %v147_v47 = vld [vmem:[#allocation6 + $0x208] sm:$0xff] }
  0x55   :  { %1303 = vmatprep.subr.bf16.mxu1 %v1302_v31  ;;  %v140_v46 = vld [vmem:[#allocation6 + $0x1d0] sm:$0xff]  ;;  %v155_v48 = vld [vmem:[#allocation6 + $0x248] sm:$0xff]  ;;  %v149_v49 = vld [vmem:[#allocation6 + $0x218] sm:$0xff]  ;;  %v1276_v51 = vpack.c.bf16 %v138_v43, %v130_v42 }
  0x56   :  { %v157_v50 = vld [vmem:[#allocation6 + $0x258] sm:$0xff]  ;;  %v1308_v52 = vpack.c.bf16 %v140_v46, %v132_v45  ;;  %v1278_v53 = vpack.c.bf16 %v155_v48, %v147_v47  ;;  %v146_v54 = vld [vmem:[#allocation6 + $0x200] sm:$0xff]  ;;  %v148_v56 = vld [vmem:[#allocation6 + $0x210] sm:$0xff] }
  0x57   :  { %1273 = vmatpush1.bf16.msra.mxu0 %v1272_v35  ;;  %v154_v55 = vld [vmem:[#allocation6 + $0x240] sm:$0xff]  ;;  %v1310_v57 = vpack.c.bf16 %v157_v50, %v149_v49  ;;  %v156_v58 = vld [vmem:[#allocation6 + $0x250] sm:$0xff]  ;;  %v163_v59 = vld [vmem:[#allocation6 + $0x288] sm:$0xff] }
  0x58   :  { %1305 = vmatpush1.bf16.msra.mxu1 %v1304_v39  ;;  %1275 = vmatprep.subr.bf16.mxu0 %v1274_v40  ;;  %v171_v60 = vld [vmem:[#allocation6 + $0x2c8] sm:$0xff]  ;;  %v165_v61 = vld [vmem:[#allocation6 + $0x298] sm:$0xff]  ;;  %v1280_v63 = vpack.c.bf16 %v154_v55, %v146_v54  ;;  %v1312_v1 = vpack.c.bf16 %v156_v58, %v148_v56  ;;  %v162_v3 = vld [vmem:[#allocation6 + $0x280] sm:$0xff] }
  0x59   :  { %1307 = vmatprep.subr.bf16.mxu1 %v1306_v44  ;;  %v173_v62 = vld [vmem:[#allocation6 + $0x2d8] sm:$0xff]  ;;  %v1282_v2 = vpack.c.bf16 %v171_v60, %v163_v59  ;;  %v170_v4 = vld [vmem:[#allocation6 + $0x2c0] sm:$0xff]  ;;  %v164_v5 = vld [vmem:[#allocation6 + $0x290] sm:$0xff] }
  0x5a   :  { %v1314_v6 = vpack.c.bf16 %v173_v62, %v165_v61  ;;  %v172_v7 = vld [vmem:[#allocation6 + $0x2d0] sm:$0xff]  ;;  %v179_v8 = vld [vmem:[#allocation6 + $0x308] sm:$0xff]  ;;  %v181_v10 = vld [vmem:[#allocation6 + $0x318] sm:$0xff]  ;;  %v1284_v12 = vpack.c.bf16 %v170_v4, %v162_v3 }
  0x5b   :  { %1277 = vmatpush1.bf16.msra.mxu0 %v1276_v51  ;;  %v187_v9 = vld [vmem:[#allocation6 + $0x348] sm:$0xff]  ;;  %v189_v11 = vld [vmem:[#allocation6 + $0x358] sm:$0xff]  ;;  %v1316_v13 = vpack.c.bf16 %v172_v7, %v164_v5  ;;  %v178_v15 = vld [vmem:[#allocation6 + $0x300] sm:$0xff] }
  0x5c   :  { %1309 = vmatpush1.bf16.msra.mxu1 %v1308_v52  ;;  %1279 = vmatprep.subr.bf16.mxu0 %v1278_v53  ;;  %v1286_v14 = vpack.c.bf16 %v187_v9, %v179_v8  ;;  %v186_v16 = vld [vmem:[#allocation6 + $0x340] sm:$0xff]  ;;  %v180_v17 = vld [vmem:[#allocation6 + $0x310] sm:$0xff]  ;;  %v1318_v18 = vpack.c.bf16 %v189_v11, %v181_v10  ;;  %v195_v20 = vld [vmem:[#allocation6 + $0x388] sm:$0xff] }
  0x5d   :  { %1311 = vmatprep.subr.bf16.mxu1 %v1310_v57  ;;  %v188_v19 = vld [vmem:[#allocation6 + $0x350] sm:$0xff]  ;;  %v203_v21 = vld [vmem:[#allocation6 + $0x3c8] sm:$0xff]  ;;  %v197_v22 = vld [vmem:[#allocation6 + $0x398] sm:$0xff]  ;;  %v1288_v24 = vpack.c.bf16 %v186_v16, %v178_v15 }
  0x5e   :  { %v205_v23 = vld [vmem:[#allocation6 + $0x3d8] sm:$0xff]  ;;  %v1320_v25 = vpack.c.bf16 %v188_v19, %v180_v17  ;;  %v1290_v26 = vpack.c.bf16 %v203_v21, %v195_v20  ;;  %v194_v27 = vld [vmem:[#allocation6 + $0x380] sm:$0xff]  ;;  %v196_v29 = vld [vmem:[#allocation6 + $0x390] sm:$0xff] }
  0x5f   :  { %1281 = vmatpush1.bf16.msra.mxu0 %v1280_v63  ;;  %v202_v28 = vld [vmem:[#allocation6 + $0x3c0] sm:$0xff]  ;;  %v1322_v30 = vpack.c.bf16 %v205_v23, %v197_v22  ;;  %v204_v31 = vld [vmem:[#allocation6 + $0x3d0] sm:$0xff]  ;;  %v87_v32 = vld [vmem:[#allocation6 + $0x28] sm:$0xff] }
  0x60   :  { %1313 = vmatpush1.bf16.msra.mxu1 %v1312_v1  ;;  %1283 = vmatprep.subr.bf16.mxu0 %v1282_v2  ;;  %v95_v33 = vld [vmem:[#allocation6 + $0x68] sm:$0xff]  ;;  %v89_v34 = vld [vmem:[#allocation6 + $0x38] sm:$0xff]  ;;  %v1292_v36 = vpack.c.bf16 %v202_v28, %v194_v27  ;;  %v1324_v37 = vpack.c.bf16 %v204_v31, %v196_v29  ;;  %v86_v39 = vld [vmem:[#allocation6 + $0x20] sm:$0xff] }
  0x61   :  { %1315 = vmatprep.subr.bf16.mxu1 %v1314_v6  ;;  %v97_v35 = vld [vmem:[#allocation6 + $0x78] sm:$0xff]  ;;  %v1326_v38 = vpack.c.bf16 %v95_v33, %v87_v32  ;;  %v94_v40 = vld [vmem:[#allocation6 + $0x60] sm:$0xff]  ;;  %v88_v41 = vld [vmem:[#allocation6 + $0x30] sm:$0xff] }
  0x62   :  { %v1358_v42 = vpack.c.bf16 %v97_v35, %v89_v34  ;;  %v96_v43 = vld [vmem:[#allocation6 + $0x70] sm:$0xff]  ;;  %v103_v44 = vld [vmem:[#allocation6 + $0xa8] sm:$0xff]  ;;  %v105_v46 = vld [vmem:[#allocation6 + $0xb8] sm:$0xff]  ;;  %v1328_v49 = vpack.c.bf16 %v94_v40, %v86_v39 }
  0x63   :  { %1285 = vmatpush1.bf16.msra.mxu0 %v1284_v12  ;;  %v111_v45 = vld [vmem:[#allocation6 + $0xe8] sm:$0xff]  ;;  %v113_v47 = vld [vmem:[#allocation6 + $0xf8] sm:$0xff]  ;;  %v1781_v48 = vld [vmem:[#allocation3] sm:$0xff]  ;;  %v1360_v50 = vpack.c.bf16 %v96_v43, %v88_v41 }
  0x64   :  { %1317 = vmatpush1.bf16.msra.mxu1 %v1316_v13  ;;  %1287 = vmatprep.subr.bf16.mxu0 %v1286_v14  ;;  %v1330_v51 = vpack.c.bf16 %v111_v45, %v103_v44  ;;  %v102_v52 = vld [vmem:[#allocation6 + $0xa0] sm:$0xff]  ;;  %v104_v54 = vld [vmem:[#allocation6 + $0xb0] sm:$0xff]  ;;  %v1362_v55 = vpack.c.bf16 %v113_v47, %v105_v46  ;;  %v119_v57 = vld [vmem:[#allocation6 + $0x128] sm:$0xff] }
  0x65   :  { %1319 = vmatprep.subr.bf16.mxu1 %v1318_v18  ;;  %v110_v53 = vld [vmem:[#allocation6 + $0xe0] sm:$0xff]  ;;  %v112_v56 = vld [vmem:[#allocation6 + $0xf0] sm:$0xff]  ;;  %v127_v58 = vld [vmem:[#allocation6 + $0x168] sm:$0xff] }
  0x66   :  { %v121_v59 = vld [vmem:[#allocation6 + $0x138] sm:$0xff]  ;;  %v1332_v61 = vpack.c.bf16 %v110_v53, %v102_v52  ;;  %v1364_v63 = vpack.c.bf16 %v112_v56, %v104_v54  ;;  %v1334_v1 = vpack.c.bf16 %v127_v58, %v119_v57  ;;  %v118_v2 = vld [vmem:[#allocation6 + $0x120] sm:$0xff]  ;;  %v120_v4 = vld [vmem:[#allocation6 + $0x130] sm:$0xff] }
  0x67   :  { %1289 = vmatpush1.bf16.msra.mxu0 %v1288_v24  ;;  %v129_v60 = vld [vmem:[#allocation6 + $0x178] sm:$0xff]  ;;  %v126_v3 = vld [vmem:[#allocation6 + $0x160] sm:$0xff]  ;;  %v128_v6 = vld [vmem:[#allocation6 + $0x170] sm:$0xff] }
  0x68   :  { %1321 = vmatpush1.bf16.msra.mxu1 %v1320_v25  ;;  %1291 = vmatprep.subr.bf16.mxu0 %v1290_v26  ;;  %v1785_v62 = vld [vmem:[#allocation3 + $0x8] sm:$0xff]  ;;  %v1366_v5 = vpack.c.bf16 %v129_v60, %v121_v59  ;;  %v135_v7 = vld [vmem:[#allocation6 + $0x1a8] sm:$0xff]  ;;  %v1336_v11 = vpack.c.bf16 %v126_v3, %v118_v2  ;;  %v1368_v12 = vpack.c.bf16 %v128_v6, %v120_v4  ;;  %v134_v14 = vld [vmem:[#allocation6 + $0x1a0] sm:$0xff] }
  0x69   :  { %1323 = vmatprep.subr.bf16.mxu1 %v1322_v30  ;;  %v143_v8 = vld [vmem:[#allocation6 + $0x1e8] sm:$0xff]  ;;  %v137_v9 = vld [vmem:[#allocation6 + $0x1b8] sm:$0xff]  ;;  %v142_v15 = vld [vmem:[#allocation6 + $0x1e0] sm:$0xff] }
  0x6a   :  { %v145_v10 = vld [vmem:[#allocation6 + $0x1f8] sm:$0xff]  ;;  %v1338_v13 = vpack.c.bf16 %v143_v8, %v135_v7  ;;  %v136_v16 = vld [vmem:[#allocation6 + $0x1b0] sm:$0xff]  ;;  %v151_v19 = vld [vmem:[#allocation6 + $0x228] sm:$0xff]  ;;  %v1340_v23 = vpack.c.bf16 %v142_v15, %v134_v14 }
  0x6b   :  { %1293 = vmatpush1.bf16.msra.mxu0 %v1292_v36  ;;  %v1370_v17 = vpack.c.bf16 %v145_v10, %v137_v9  ;;  %v144_v18 = vld [vmem:[#allocation6 + $0x1f0] sm:$0xff]  ;;  %v159_v20 = vld [vmem:[#allocation6 + $0x268] sm:$0xff]  ;;  %v153_v21 = vld [vmem:[#allocation6 + $0x238] sm:$0xff] }
  0x6c   :  { %1325 = vmatpush1.bf16.msra.mxu1 %v1324_v37  ;;  %1327 = vmatprep.subr.bf16.mxu0 %v1326_v38  ;;  %v161_v22 = vld [vmem:[#allocation6 + $0x278] sm:$0xff]  ;;  %v1372_v24 = vpack.c.bf16 %v144_v18, %v136_v16  ;;  %v1342_v25 = vpack.c.bf16 %v159_v20, %v151_v19  ;;  %v150_v26 = vld [vmem:[#allocation6 + $0x220] sm:$0xff]  ;;  %v152_v28 = vld [vmem:[#allocation6 + $0x230] sm:$0xff] }
  0x6d   :  { %1359 = vmatprep.subr.bf16.mxu1 %v1358_v42  ;;  %v158_v27 = vld [vmem:[#allocation6 + $0x260] sm:$0xff]  ;;  %v1374_v29 = vpack.c.bf16 %v161_v22, %v153_v21  ;;  %v160_v30 = vld [vmem:[#allocation6 + $0x270] sm:$0xff]  ;;  %v167_v31 = vld [vmem:[#allocation6 + $0x2a8] sm:$0xff] }
  0x6e   :  { %317 = vmatmul.mubr.f32.vlgmr.msra.gmra.mrb[0].mxu0 %v1781_v48  ;;  %v175_v32 = vld [vmem:[#allocation6 + $0x2e8] sm:$0xff]  ;;  %v169_v33 = vld [vmem:[#allocation6 + $0x2b8] sm:$0xff]  ;;  %v1344_v35 = vpack.c.bf16 %v158_v27, %v150_v26  ;;  %v1376_v36 = vpack.c.bf16 %v160_v30, %v152_v28  ;;  %v166_v38 = vld [vmem:[#allocation6 + $0x2a0] sm:$0xff] }
  0x6f   :  { %394 = vmatmul.mubr.f32.vlgmr.msra.gmra.mrb[0].mxu1 %v1781_v48  ;;  %1329 = vmatpush1.bf16.msra.mxu0 %v1328_v49  ;;  %v177_v34 = vld [vmem:[#allocation6 + $0x2f8] sm:$0xff]  ;;  %v1346_v37 = vpack.c.bf16 %v175_v32, %v167_v31  ;;  %v174_v39 = vld [vmem:[#allocation6 + $0x2e0] sm:$0xff]  ;;  %v168_v40 = vld [vmem:[#allocation6 + $0x2b0] sm:$0xff] }
  0x70   :  { %1361 = vmatpush1.bf16.msra.mxu1 %v1360_v50  ;;  %1331 = vmatprep.subr.bf16.mxu0 %v1330_v51  ;;  %v1378_v41 = vpack.c.bf16 %v177_v34, %v169_v33  ;;  %v176_v42 = vld [vmem:[#allocation6 + $0x2f0] sm:$0xff]  ;;  %v183_v43 = vld [vmem:[#allocation6 + $0x328] sm:$0xff]  ;;  %v185_v45 = vld [vmem:[#allocation6 + $0x338] sm:$0xff]  ;;  %v1348_v47 = vpack.c.bf16 %v174_v39, %v166_v38 }
  0x71   :  { %1363 = vmatprep.subr.bf16.mxu1 %v1362_v55  ;;  %322 = vmatprep.mubr.f32.mxu0 %v1686_v0  ;;  %v191_v44 = vld [vmem:[#allocation6 + $0x368] sm:$0xff]  ;;  %v193_v46 = vld [vmem:[#allocation6 + $0x378] sm:$0xff]  ;;  %v1380_v49 = vpack.c.bf16 %v176_v42, %v168_v40  ;;  %v182_v51 = vld [vmem:[#allocation6 + $0x320] sm:$0xff] }
  0x72   :  { %399 = vmatprep.mubr.f32.mxu1 %v1686_v0  ;;  %323 = vmatmul.mubr.f32.gmra.mrb[2].mxu0 %v1785_v62  ;;  %v1350_v50 = vpack.c.bf16 %v191_v44, %v183_v43  ;;  %v190_v52 = vld [vmem:[#allocation6 + $0x360] sm:$0xff]  ;;  %v184_v53 = vld [vmem:[#allocation6 + $0x330] sm:$0xff]  ;;  %v1382_v54 = vpack.c.bf16 %v193_v46, %v185_v45  ;;  %v199_v56 = vld [vmem:[#allocation6 + $0x3a8] sm:$0xff] }
  0x73   :  { %1333 = vmatpush1.bf16.msra.mxu0 %v1332_v61  ;;  %400 = vmatmul.mubr.f32.gmra.mrb[2].mxu1 %v1785_v62  ;;  %v192_v55 = vld [vmem:[#allocation6 + $0x370] sm:$0xff]  ;;  %v207_v57 = vld [vmem:[#allocation6 + $0x3e8] sm:$0xff]  ;;  %v201_v58 = vld [vmem:[#allocation6 + $0x3b8] sm:$0xff]  ;;  %v1352_v60 = vpack.c.bf16 %v190_v52, %v182_v51 }
  0x74   :  { %1365 = vmatpush1.bf16.msra.mxu1 %v1364_v63  ;;  %1335 = vmatprep.subr.bf16.mxu0 %v1334_v1  ;;  %v209_v59 = vld [vmem:[#allocation6 + $0x3f8] sm:$0xff]  ;;  %v1384_v61 = vpack.c.bf16 %v192_v55, %v184_v53  ;;  %v1354_v63 = vpack.c.bf16 %v207_v57, %v199_v56  ;;  %v198_v1 = vld [vmem:[#allocation6 + $0x3a0] sm:$0xff]  ;;  %v200_v3 = vld [vmem:[#allocation6 + $0x3b0] sm:$0xff] }
  0x75   :  { %1367 = vmatprep.subr.bf16.mxu1 %v1366_v5  ;;  %470 = vmatprep.mubr.f32.mxu0 %v1686_v0  ;;  %v206_v2 = vld [vmem:[#allocation6 + $0x3e0] sm:$0xff]  ;;  %v1386_v4 = vpack.c.bf16 %v209_v59, %v201_v58  ;;  %v208_v5 = vld [vmem:[#allocation6 + $0x3f0] sm:$0xff]  ;;  %v658_v6 = vld [vmem:[#allocation9 + $0x80] sm:$0xff] }
  0x76   :  { %547 = vmatprep.mubr.f32.mxu1 %v1686_v0  ;;  %v659_v7 = vld [vmem:[#allocation9 + $0x88] sm:$0xff]  ;;  %v690_v8 = vld [vmem:[#allocation9 + $0x180] sm:$0xff]  ;;  %v1356_v10 = vpack.c.bf16 %v206_v2, %v198_v1  ;;  %v660_v18 = vld [vmem:[#allocation9 + $0x90] sm:$0xff] }
  0x77   :  { %1337 = vmatpush1.bf16.msra.mxu0 %v1336_v11  ;;  %v691_v9 = vld [vmem:[#allocation9 + $0x188] sm:$0xff]  ;;  %v1388_v11 = vpack.c.bf16 %v208_v5, %v200_v3  ;;  %v642_v14 = vld [vmem:[#allocation9] sm:$0xff]  ;;  %v661_v19 = vld [vmem:[#allocation9 + $0x98] sm:$0xff] }
  0x78   :  { %1369 = vmatpush1.bf16.msra.mxu1 %v1368_v12  ;;  %1339 = vmatprep.subr.bf16.mxu0 %v1338_v13  ;;  %v1390_v12 = vpack.c.bf16 %v659_v7, %v658_v6  ;;  %v1422_v13 = vpack.c.bf16 %v691_v9, %v690_v8  ;;  %v643_v15 = vld [vmem:[#allocation9 + $0x8] sm:$0xff]  ;;  %v674_v16 = vld [vmem:[#allocation9 + $0x100] sm:$0xff]  ;;  %v692_v20 = vld [vmem:[#allocation9 + $0x190] sm:$0xff] }
  0x79   :  { %1371 = vmatprep.subr.bf16.mxu1 %v1370_v17  ;;  %v675_v17 = vld [vmem:[#allocation9 + $0x108] sm:$0xff]  ;;  %v693_v21 = vld [vmem:[#allocation9 + $0x198] sm:$0xff]  ;;  %v1392_v22 = vpack.c.bf16 %v643_v15, %v642_v14  ;;  %v676_v27 = vld [vmem:[#allocation9 + $0x110] sm:$0xff] }
  0x7a   :  { %v645_v26 = vld [vmem:[#allocation9 + $0x18] sm:$0xff]  ;;  %v1426_v28 = vpack.c.bf16 %v693_v21, %v692_v20  ;;  %v662_v30 = vld [vmem:[#allocation9 + $0xa0] sm:$0xff]  ;;  %v663_v31 = vld [vmem:[#allocation9 + $0xa8] sm:$0xff] }
  0x7b   :  { %1341 = vmatpush1.bf16.msra.mxu0 %v1340_v23  ;;  %v1424_v23 = vpack.c.bf16 %v675_v17, %v674_v16  ;;  %v694_v32 = vld [vmem:[#allocation9 + $0x1a0] sm:$0xff]  ;;  %v695_v33 = vld [vmem:[#allocation9 + $0x1a8] sm:$0xff]  ;;  %v664_v42 = vld [vmem:[#allocation9 + $0xb0] sm:$0xff] }
  0x7c   :  { %1373 = vmatpush1.bf16.msra.mxu1 %v1372_v24  ;;  %1343 = vmatprep.subr.bf16.mxu0 %v1342_v25  ;;  %v1394_v24 = vpack.c.bf16 %v661_v19, %v660_v18  ;;  %v644_v25 = vld [vmem:[#allocation9 + $0x10] sm:$0xff]  ;;  %v647_v38 = vld [vmem:[#allocation9 + $0x28] sm:$0xff]  ;;  %v1430_v39 = vpack.c.bf16 %v695_v33, %v694_v32  ;;  %v678_v40 = vld [vmem:[#allocation9 + $0x120] sm:$0xff] }
  0x7d   :  { %1375 = vmatprep.subr.bf16.mxu1 %v1374_v29  ;;  %v677_v29 = vld [vmem:[#allocation9 + $0x118] sm:$0xff]  ;;  %v1396_v34 = vpack.c.bf16 %v645_v26, %v644_v25  ;;  %v696_v44 = vld [vmem:[#allocation9 + $0x1b0] sm:$0xff]  ;;  %v667_v55 = vld [vmem:[#allocation9 + $0xc8] sm:$0xff] }
  0x7e   :  { %v665_v43 = vld [vmem:[#allocation9 + $0xb8] sm:$0xff]  ;;  %v680_v52 = vld [vmem:[#allocation9 + $0x130] sm:$0xff]  ;;  %v698_v56 = vld [vmem:[#allocation9 + $0x1c0] sm:$0xff] }
  0x7f   :  { %1345 = vmatpush1.bf16.msra.mxu0 %v1344_v35  ;;  %v1428_v35 = vpack.c.bf16 %v677_v29, %v676_v27  ;;  %v1402_v45 = vpack.c.bf16 %v665_v43, %v664_v42  ;;  %v697_v46 = vld [vmem:[#allocation9 + $0x1b8] sm:$0xff]  ;;  %v699_v58 = vld [vmem:[#allocation9 + $0x1c8] sm:$0xff]  ;;  %v650_v59 = vld [vmem:[#allocation9 + $0x40] sm:$0xff] }
  0x80   :  { %1377 = vmatpush1.bf16.msra.mxu1 %v1376_v36  ;;  %1347 = vmatprep.subr.bf16.mxu0 %v1346_v37  ;;  %v1398_v36 = vpack.c.bf16 %v663_v31, %v662_v30  ;;  %v646_v37 = vld [vmem:[#allocation9 + $0x20] sm:$0xff]  ;;  %v681_v53 = vld [vmem:[#allocation9 + $0x138] sm:$0xff]  ;;  %v683_v2 = vld [vmem:[#allocation9 + $0x148] sm:$0xff] }
  0x81   :  { %1379 = vmatprep.subr.bf16.mxu1 %v1378_v41  ;;  %v1400_v41 = vpack.c.bf16 %v647_v38, %v646_v37  ;;  %v682_v1 = vld [vmem:[#allocation9 + $0x140] sm:$0xff]  ;;  %v669_v5 = vld [vmem:[#allocation9 + $0xd8] sm:$0xff]  ;;  %v700_v6 = vld [vmem:[#allocation9 + $0x1d0] sm:$0xff] }
  0x82   :  { %v1440_v3 = vpack.c.bf16 %v683_v2, %v682_v1  ;;  %v701_v8 = vld [vmem:[#allocation9 + $0x1d8] sm:$0xff]  ;;  %v652_v9 = vld [vmem:[#allocation9 + $0x50] sm:$0xff]  ;;  %v670_v16 = vld [vmem:[#allocation9 + $0xe0] sm:$0xff] }
  0x83   :  { %1349 = vmatpush1.bf16.msra.mxu0 %v1348_v47  ;;  %v648_v47 = vld [vmem:[#allocation9 + $0x30] sm:$0xff]  ;;  %v685_v14 = vld [vmem:[#allocation9 + $0x158] sm:$0xff]  ;;  %v671_v17 = vld [vmem:[#allocation9 + $0xe8] sm:$0xff] }
  0x84   :  { %1381 = vmatpush1.bf16.msra.mxu1 %v1380_v49  ;;  %1351 = vmatprep.subr.bf16.mxu0 %v1350_v50  ;;  %v649_v49 = vld [vmem:[#allocation9 + $0x38] sm:$0xff]  ;;  %v1434_v50 = vpack.c.bf16 %v697_v46, %v696_v44  ;;  %v702_v18 = vld [vmem:[#allocation9 + $0x1e0] sm:$0xff]  ;;  %v1414_v19 = vpack.c.bf16 %v671_v17, %v670_v16  ;;  %v703_v20 = vld [vmem:[#allocation9 + $0x1e8] sm:$0xff]  ;;  %v212_v44 = vlaneseq }
  0x85   :  { %1383 = vmatprep.subr.bf16.mxu1 %v1382_v54  ;;  %v1404_v51 = vpack.c.bf16 %v649_v49, %v648_v47  ;;  %v666_v54 = vld [vmem:[#allocation9 + $0xc0] sm:$0xff]  ;;  %v687_v26 = vld [vmem:[#allocation9 + $0x168] sm:$0xff]  ;;  %v673_v29 = vld [vmem:[#allocation9 + $0xf8] sm:$0xff] }
  0x86   :  { %v1406_v57 = vpack.c.bf16 %v667_v55, %v666_v54  ;;  %v654_v21 = vld [vmem:[#allocation9 + $0x60] sm:$0xff]  ;;  %v704_v30 = vld [vmem:[#allocation9 + $0x1f0] sm:$0xff]  ;;  %v705_v32 = vld [vmem:[#allocation9 + $0x1f8] sm:$0xff] }
  0x87   :  { %1353 = vmatpush1.bf16.msra.mxu0 %v1352_v60  ;;  %v651_v60 = vld [vmem:[#allocation9 + $0x48] sm:$0xff]  ;;  %v686_v25 = vld [vmem:[#allocation9 + $0x160] sm:$0xff]  ;;  %v656_v33 = vld [vmem:[#allocation9 + $0x70] sm:$0xff] }
  0x88   :  { %1385 = vmatpush1.bf16.msra.mxu1 %v1384_v61  ;;  %1355 = vmatprep.subr.bf16.mxu0 %v1354_v63  ;;  %v1438_v61 = vpack.c.bf16 %v699_v58, %v698_v56  ;;  %v1408_v63 = vpack.c.bf16 %v651_v60, %v650_v59  ;;  %v1448_v27 = vpack.c.bf16 %v687_v26, %v686_v25  ;;  %v688_v37 = vld [vmem:[#allocation9 + $0x170] sm:$0xff]  ;;  %v689_v38 = vld [vmem:[#allocation9 + $0x178] sm:$0xff]  ;;  %v755_v42 = vld [vmem:[#allocation9 + $0x388] sm:$0xff] }
  0x89   :  { %1387 = vmatprep.subr.bf16.mxu1 %v1386_v4  ;;  %v668_v4 = vld [vmem:[#allocation9 + $0xd0] sm:$0xff]  ;;  %v1802_v47 = vld [vmem:[#allocation8] sm:$0xff] }
  0x8a   :  { %v1410_v7 = vpack.c.bf16 %v669_v5, %v668_v4  ;;  %v724_v25 = vld [vmem:[#allocation9 + $0x290] sm:$0xff]  ;;  %v725_v26 = vld [vmem:[#allocation9 + $0x298] sm:$0xff] }
  0x8b   :  { %1357 = vmatpush1.bf16.msra.mxu0 %v1356_v10  ;;  %v653_v10 = vld [vmem:[#allocation9 + $0x58] sm:$0xff] }
  0x8c   :  { %1389 = vmatpush1.bf16.msra.mxu1 %v1388_v11  ;;  %1391 = vmatprep.subr.bf16.mxu0 %v1390_v12  ;;  %v1442_v11 = vpack.c.bf16 %v701_v8, %v700_v6  ;;  %v1412_v12 = vpack.c.bf16 %v653_v10, %v652_v9 }
  0x8d   :  { %1423 = vmatprep.subr.bf16.mxu1 %v1422_v13  ;;  %v684_v13 = vld [vmem:[#allocation9 + $0x150] sm:$0xff] }
  0x8e   :  { %471 = vmatmul.mubr.f32.vlgmr.msra.gmra.mrb[4].mxu0 %v1781_v48  ;;  %v1444_v15 = vpack.c.bf16 %v685_v14, %v684_v13 }
  0x8f   :  { %548 = vmatmul.mubr.f32.vlgmr.msra.gmra.mrb[4].mxu1 %v1781_v48  ;;  %476 = vmatprep.mubr.f32.mxu0 %v1686_v0  ;;  %v679_v48 = vld [vmem:[#allocation9 + $0x128] sm:$0xff] }
  0x90   :  { %553 = vmatprep.mubr.f32.mxu1 %v1686_v0  ;;  %1393 = vmatpush3.bf16.msra.mxu0 %v1392_v22  ;;  %v1432_v0 = vpack.c.bf16 %v679_v48, %v678_v40  ;;  %v655_v22 = vld [vmem:[#allocation9 + $0x68] sm:$0xff]  ;;  %v722_v40 = vld [vmem:[#allocation9 + $0x280] sm:$0xff] }
  0x91   :  { %1425 = vmatpush3.bf16.msra.mxu1 %v1424_v23  ;;  %1395 = vmatprep.subr.bf16.mxu0 %v1394_v24  ;;  %v1446_v23 = vpack.c.bf16 %v703_v20, %v702_v18  ;;  %v1416_v24 = vpack.c.bf16 %v655_v22, %v654_v21  ;;  %v723_v48 = vld [vmem:[#allocation9 + $0x288] sm:$0xff]  ;;  %v738_v21 = vld [vmem:[#allocation9 + $0x300] sm:$0xff] }
  0x92   :  { %477 = vmatmul.mubr.f32.gmra.mrb[6].mxu0 %v1785_v62  ;;  %1427 = vmatprep.subr.bf16.mxu1 %v1426_v28  ;;  %v672_v28 = vld [vmem:[#allocation9 + $0xf0] sm:$0xff]  ;;  %v707_v20 = vld [vmem:[#allocation9 + $0x208] sm:$0xff] }
  0x93   :  { %554 = vmatmul.mubr.f32.gmra.mrb[6].mxu1 %v1785_v62  ;;  %v1436_v62 = vpack.c.bf16 %v681_v53, %v680_v52  ;;  %v1418_v31 = vpack.c.bf16 %v673_v29, %v672_v28 }
  0x94   :  { %1397 = vmatpush3.bf16.msra.mxu0 %v1396_v34  ;;  %v657_v34 = vld [vmem:[#allocation9 + $0x78] sm:$0xff] }
  0x95   :  { %1429 = vmatpush3.bf16.msra.mxu1 %v1428_v35  ;;  %1399 = vmatprep.subr.bf16.mxu0 %v1398_v36  ;;  %v1450_v35 = vpack.c.bf16 %v705_v32, %v704_v30  ;;  %v1420_v36 = vpack.c.bf16 %v657_v34, %v656_v33  ;;  %v757_v32 = vld [vmem:[#allocation9 + $0x398] sm:$0xff] }
  0x96   :  { %1431 = vmatprep.subr.bf16.mxu1 %v1430_v39  ;;  %v1452_v39 = vpack.c.bf16 %v689_v38, %v688_v37 }
  0x98   :  { %1401 = vmatpush3.bf16.msra.mxu0 %v1400_v41  ;;  %v754_v41 = vld [vmem:[#allocation9 + $0x380] sm:$0xff] }
  0x99   :  { %1433 = vmatpush3.bf16.msra.mxu1 %v1432_v0  ;;  %1403 = vmatprep.subr.bf16.mxu0 %v1402_v45  ;;  %v1454_v0 = vpack.c.bf16 %v723_v48, %v722_v40  ;;  %v1486_v43 = vpack.c.bf16 %v755_v42, %v754_v41  ;;  %v1799_v45 = vshrl.u32 %v212_v44, 7  ;;  %v1458_v48 = vpack.c.bf16 %v725_v26, %v724_v25  ;;  %v708_v41 = vld [vmem:[#allocation9 + $0x210] sm:$0xff] }
  0x9a   :  { %1435 = vmatprep.subr.bf16.mxu1 %v1434_v50 }
  0x9b   :  { %v214_v46 = vsub.s32 0, %v1799_v45  ;;  %v222_v49 = vsub.s32 2, %v1799_v45  ;;  %v218_v50 = vsub.s32 1, %v1799_v45 }
  0x9c   :  { %1405 = vmatpush3.bf16.msra.mxu0 %v1404_v51  ;;  %v226_v51 = vsub.s32 3, %v1799_v45 }
  0x9d   :  { %1437 = vmatpush3.bf16.msra.mxu1 %v1436_v62  ;;  %1407 = vmatprep.subr.bf16.mxu0 %v1406_v57  ;;  %v215_v52 = vrot.slane %v1802_v47, %v214_v46  ;;  %v223_v53 = vrot.slane %v1802_v47, %v222_v49  ;;  %v219_v62 = vrot.slane %v1802_v47, %v218_v50  ;;  %v740_v50 = vld [vmem:[#allocation9 + $0x310] sm:$0xff] }
  0x9e   :  { %1439 = vmatprep.subr.bf16.mxu1 %v1438_v61  ;;  %v227_v54 = vrot.slane %v1802_v47, %v226_v51  ;;  %v741_v51 = vld [vmem:[#allocation9 + $0x318] sm:$0xff] }
  0xa0   :  { %1409 = vmatpush3.bf16.msra.mxu0 %v1408_v63 }
  0xa1   :  { %1441 = vmatpush3.bf16.msra.mxu1 %v1440_v3  ;;  %1411 = vmatprep.subr.bf16.mxu0 %v1410_v7 }
  0xa2   :  { %1443 = vmatprep.subr.bf16.mxu1 %v1442_v11 }
  0xa4   :  { %1413 = vmatpush3.bf16.msra.mxu0 %v1412_v12 }
  0xa5   :  { %1445 = vmatpush3.bf16.msra.mxu1 %v1444_v15  ;;  %1415 = vmatprep.subr.bf16.mxu0 %v1414_v19  ;;  %v706_v19 = vld [vmem:[#allocation9 + $0x200] sm:$0xff] }
  0xa6   :  { %1447 = vmatprep.subr.bf16.mxu1 %v1446_v23 }
  0xa8   :  { %1417 = vmatpush3.bf16.msra.mxu0 %v1416_v24  ;;  %v739_v24 = vld [vmem:[#allocation9 + $0x308] sm:$0xff] }
  0xa9   :  { %1449 = vmatpush3.bf16.msra.mxu1 %v1448_v27  ;;  %1419 = vmatprep.subr.bf16.mxu0 %v1418_v31  ;;  %v756_v31 = vld [vmem:[#allocation9 + $0x390] sm:$0xff]  ;;  %v1488_v40 = vpack.c.bf16 %v739_v24, %v738_v21 }
  0xaa   :  { %1451 = vmatprep.subr.bf16.mxu1 %v1450_v35  ;;  %v1490_v49 = vpack.c.bf16 %v757_v32, %v756_v31  ;;  %v760_v21 = vld [vmem:[#allocation9 + $0x3b0] sm:$0xff]  ;;  %v745_v32 = vld [vmem:[#allocation9 + $0x338] sm:$0xff] }
  0xac   :  { %1421 = vmatpush3.bf16.msra.mxu0 %v1420_v36  ;;  %v1456_v36 = vpack.c.bf16 %v707_v20, %v706_v19  ;;  %v242_v19 = vsub.s32 7, %v1799_v45 }
  0xad   :  { %1453 = vmatpush3.bf16.msra.mxu1 %v1452_v39  ;;  %1455 = vmatprep.subr.bf16.mxu0 %v1454_v0  ;;  %v709_v0 = vld [vmem:[#allocation9 + $0x218] sm:$0xff] }
  0xae   :  { %1487 = vmatprep.subr.bf16.mxu1 %v1486_v43 }
 0x141   :  { %v318_v55 = vpop.f32.mrb[0].mxu0 }
 0x142   :  { %v319_v56 = vadd.f32 %v318_v55, %v215_v52  ;;  %v395_v57 = vpop.f32.mrb[0].mxu1  ;;  %v320_v58 = vpop.f32.mrb[1].mxu0 }
 0x143   :  { %v396_v59 = vadd.f32 %v395_v57, %v223_v53  ;;  %v321_v60 = vadd.f32 %v320_v58, %v219_v62  ;;  %v397_v61 = vpop.f32.mrb[1].mxu1  ;;  %v727_v57 = vld [vmem:[#allocation9 + $0x2a8] sm:$0xff]  ;;  %v758_v58 = vld [vmem:[#allocation9 + $0x3a0] sm:$0xff] }
 0x144   :  { %v576_v63 = vmul.f32 0.70710677, %v319_v56  ;;  %v398_v1 = vadd.f32 %v397_v61, %v227_v54  ;;  %v560_v33 = vmul.f32 0.5, %v319_v56 }
 0x145   :  { %v578_v2 = vmul.f32 0.70710677, %v396_v59  ;;  %v577_v3 = vmul.f32 0.70710677, %v321_v60  ;;  %v324_v5 = vpop.f32.mrb[2].mxu0  ;;  %v561_v29 = vmul.f32 0.5, %v321_v60 }
 0x146   :  { %1528 = verf.f32 %v576_v63  ;;  %v579_v4 = vmul.f32 0.70710677, %v398_v1  ;;  %v401_v6 = vpop.f32.mrb[2].mxu1  ;;  %v325_v7 = vadd.f32 %v324_v5, %v215_v52  ;;  %v326_v9 = vpop.f32.mrb[3].mxu0  ;;  %v563_v34 = vmul.f32 0.5, %v398_v1  ;;  %v726_v52 = vld [vmem:[#allocation9 + $0x2a0] sm:$0xff] }
 0x147   :  { %1530 = verf.f32 %v578_v2  ;;  %v402_v8 = vadd.f32 %v401_v6, %v223_v53  ;;  %v403_v10 = vpop.f32.mrb[3].mxu1  ;;  %v327_v11 = vadd.f32 %v326_v9, %v219_v62  ;;  %v562_v38 = vmul.f32 0.5, %v396_v59  ;;  %v759_v59 = vld [vmem:[#allocation9 + $0x3a8] sm:$0xff] }
 0x148   :  { %1532 = verf.f32 %v577_v3  ;;  %v404_v12 = vadd.f32 %v403_v10, %v227_v54  ;;  %v584_v13 = vmul.f32 0.70710677, %v325_v7  ;;  %v568_v54 = vmul.f32 0.5, %v325_v7  ;;  %v710_v7 = vld [vmem:[#allocation9 + $0x220] sm:$0xff]  ;;  %v711_v9 = vld [vmem:[#allocation9 + $0x228] sm:$0xff] }
 0x149   :  { %1534 = verf.f32 %v579_v4  ;;  %v586_v14 = vmul.f32 0.70710677, %v402_v8  ;;  %v585_v15 = vmul.f32 0.70710677, %v327_v11  ;;  %v569_v44 = vmul.f32 0.5, %v327_v11  ;;  %v742_v10 = vld [vmem:[#allocation9 + $0x320] sm:$0xff] }
 0x14a   :  { %1536 = verf.f32 %v584_v13  ;;  %v587_v16 = vmul.f32 0.70710677, %v404_v12  ;;  %v571_v56 = vmul.f32 0.5, %v404_v12  ;;  %v570_v61 = vmul.f32 0.5, %v402_v8  ;;  %v743_v8 = vld [vmem:[#allocation9 + $0x328] sm:$0xff] }
 0x14b   :  { %1538 = verf.f32 %v586_v14  ;;  %v1460_v3 = vpack.c.bf16 %v709_v0, %v708_v41  ;;  %v1492_v4 = vpack.c.bf16 %v741_v51, %v740_v50  ;;  %v1462_v5 = vpack.c.bf16 %v727_v57, %v726_v52  ;;  %v747_v52 = vld [vmem:[#allocation9 + $0x348] sm:$0xff]  ;;  %v765_v57 = vld [vmem:[#allocation9 + $0x3d8] sm:$0xff] }
 0x14c   :  { %1540 = verf.f32 %v585_v15  ;;  %v1494_v6 = vpack.c.bf16 %v759_v59, %v758_v58  ;;  %v230_v11 = vsub.s32 4, %v1799_v45  ;;  %v238_v13 = vsub.s32 6, %v1799_v45 }
 0x14d   :  { %1542 = verf.f32 %v587_v16  ;;  %v234_v14 = vsub.s32 5, %v1799_v45  ;;  %v1496_v24 = vpack.c.bf16 %v743_v8, %v742_v10  ;;  %v749_v8 = vld [vmem:[#allocation9 + $0x358] sm:$0xff] }
 0x14e   :  { %v231_v25 = vrot.slane %v1802_v47, %v230_v11 }
 0x14f   :  { %v235_v45 = vrot.slane %v1802_v47, %v234_v14  ;;  %v735_v14 = vld [vmem:[#allocation9 + $0x2e8] sm:$0xff] }
 0x150   :  { %v1529_v17 = vpop.eup %1528 }
 0x151   :  { %v1531_v18 = vpop.eup %1530  ;;  %v608_v23 = vadd.f32 1.0, %v1529_v17  ;;  %v728_v17 = vld [vmem:[#allocation9 + $0x2b0] sm:$0xff] }
 0x152   :  { %v1533_v22 = vpop.eup %1532  ;;  %v610_v28 = vadd.f32 1.0, %v1531_v18  ;;  %v729_v18 = vld [vmem:[#allocation9 + $0x2b8] sm:$0xff] }
 0x153   :  { %v1535_v27 = vpop.eup %1534  ;;  %v609_v30 = vadd.f32 1.0, %v1533_v22  ;;  %v624_v43 = vmul.f32 %v608_v23, %v560_v33  ;;  %v761_v22 = vld [vmem:[#allocation9 + $0x3b8] sm:$0xff]  ;;  %v1464_v23 = vpack.c.bf16 %v711_v9, %v710_v7  ;;  %v1466_v26 = vpack.c.bf16 %v729_v18, %v728_v17  ;;  %v730_v33 = vld [vmem:[#allocation9 + $0x2c0] sm:$0xff]  ;;  %v767_v18 = vld [vmem:[#allocation9 + $0x3e8] sm:$0xff] }
 0x154   :  { %v611_v35 = vadd.f32 1.0, %v1535_v27  ;;  %v1537_v37 = vpop.eup %1536  ;;  %v626_v62 = vmul.f32 %v610_v28, %v562_v38  ;;  %v712_v27 = vld [vmem:[#allocation9 + $0x230] sm:$0xff]  ;;  %v713_v28 = vld [vmem:[#allocation9 + $0x238] sm:$0xff]  ;;  %v1498_v31 = vpack.c.bf16 %v761_v22, %v760_v21  ;;  %v766_v17 = vld [vmem:[#allocation9 + $0x3e0] sm:$0xff] }
 0x155   :  { %v625_v39 = vmul.f32 %v609_v30, %v561_v29  ;;  %v1539_v42 = vpop.eup %1538  ;;  %v616_v55 = vadd.f32 1.0, %v1537_v37  ;;  %v744_v29 = vld [vmem:[#allocation9 + $0x330] sm:$0xff]  ;;  %v239_v30 = vrot.slane %v1802_v47, %v238_v13  ;;  %v763_v37 = vld [vmem:[#allocation9 + $0x3c8] sm:$0xff]  ;;  %v734_v13 = vld [vmem:[#allocation9 + $0x2e0] sm:$0xff] }
 0x156   :  { %v627_v46 = vmul.f32 %v611_v35, %v563_v34  ;;  %v1541_v53 = vpop.eup %1540  ;;  %v618_v63 = vadd.f32 1.0, %v1539_v42  ;;  %v731_v34 = vld [vmem:[#allocation9 + $0x2c8] sm:$0xff]  ;;  %v243_v35 = vrot.slane %v1802_v47, %v242_v19  ;;  %v1500_v0 = vpack.c.bf16 %v745_v32, %v744_v29  ;;  %v718_v21 = vld [vmem:[#allocation9 + $0x260] sm:$0xff]  ;;  %v768_v32 = vld [vmem:[#allocation9 + $0x3f0] sm:$0xff] }
 0x157   :  { %834 = vmatprep.mubr.f32.mxu0 %v625_v39  ;;  %v1543_v60 = vpop.eup %1542  ;;  %v617_v1 = vadd.f32 1.0, %v1541_v53  ;;  %v632_v16 = vmul.f32 %v616_v55, %v568_v54  ;;  %v1468_v39 = vpack.c.bf16 %v713_v28, %v712_v27  ;;  %v1470_v42 = vpack.c.bf16 %v731_v34, %v730_v33  ;;  %v732_v53 = vld [vmem:[#allocation9 + $0x2d0] sm:$0xff]  ;;  %v750_v27 = vld [vmem:[#allocation9 + $0x360] sm:$0xff]  ;;  %v769_v33 = vld [vmem:[#allocation9 + $0x3f8] sm:$0xff] }
 0x158   :  { %909 = vmatprep.mubr.f32.mxu1 %v627_v46  ;;  %835 = vmatmul.mubr.f32.vlgmr.msra.gmra.mrb[8].mxu0 %v624_v43  ;;  %v619_v2 = vadd.f32 1.0, %v1543_v60  ;;  %v634_v20 = vmul.f32 %v618_v63, %v570_v61  ;;  %v714_v43 = vld [vmem:[#allocation9 + $0x240] sm:$0xff]  ;;  %v716_v61 = vld [vmem:[#allocation9 + $0x250] sm:$0xff]  ;;  %v1510_v29 = vpack.c.bf16 %v767_v18, %v766_v17 }
 0x159   :  { %910 = vmatmul.mubr.f32.vlgmr.msra.gmra.mrb[8].mxu1 %v626_v62  ;;  %1457 = vmatpush3.bf16.msra.mxu0 %v1456_v36  ;;  %v633_v12 = vmul.f32 %v617_v1, %v569_v44  ;;  %v762_v36 = vld [vmem:[#allocation9 + $0x3c0] sm:$0xff]  ;;  %v715_v44 = vld [vmem:[#allocation9 + $0x248] sm:$0xff]  ;;  %v733_v62 = vld [vmem:[#allocation9 + $0x2d8] sm:$0xff] }
 0x15a   :  { %1489 = vmatpush3.bf16.msra.mxu1 %v1488_v40  ;;  %1459 = vmatprep.subr.bf16.mxu0 %v1458_v48  ;;  %v635_v15 = vmul.f32 %v619_v2, %v571_v56  ;;  %v746_v46 = vld [vmem:[#allocation9 + $0x340] sm:$0xff]  ;;  %v1502_v51 = vpack.c.bf16 %v763_v37, %v762_v36  ;;  %v764_v56 = vld [vmem:[#allocation9 + $0x3d0] sm:$0xff]  ;;  %v1472_v60 = vpack.c.bf16 %v715_v44, %v714_v43 }
 0x15b   :  { %1491 = vmatprep.subr.bf16.mxu1 %v1490_v49  ;;  %839 = vmatprep.mubr.f32.mxu0 %v633_v12  ;;  %v1506_v12 = vpack.c.bf16 %v765_v57, %v764_v56  ;;  %v720_v37 = vld [vmem:[#allocation9 + $0x270] sm:$0xff] }
 0x15c   :  { %914 = vmatprep.mubr.f32.mxu1 %v635_v15  ;;  %840 = vmatmul.mubr.f32.gmra.mrb[10].mxu0 %v632_v16 }
 0x15d   :  { %1461 = vmatpush3.bf16.msra.mxu0 %v1460_v3  ;;  %915 = vmatmul.mubr.f32.gmra.mrb[10].mxu1 %v634_v20  ;;  %v1504_v3 = vpack.c.bf16 %v747_v52, %v746_v46 }
 0x15e   :  { %1493 = vmatpush3.bf16.msra.mxu1 %v1492_v4  ;;  %1463 = vmatprep.subr.bf16.mxu0 %v1462_v5  ;;  %v1474_v4 = vpack.c.bf16 %v733_v62, %v732_v53  ;;  %v717_v5 = vld [vmem:[#allocation9 + $0x258] sm:$0xff] }
 0x15f   :  { %1495 = vmatprep.subr.bf16.mxu1 %v1494_v6  ;;  %v748_v6 = vld [vmem:[#allocation9 + $0x350] sm:$0xff]  ;;  %v1476_v20 = vpack.c.bf16 %v717_v5, %v716_v61 }
 0x161   :  { %1465 = vmatpush3.bf16.msra.mxu0 %v1464_v23  ;;  %v472_v38 = vpop.f32.mrb[4].mxu0 }
 0x162   :  { %1497 = vmatpush3.bf16.msra.mxu1 %v1496_v24  ;;  %v1819_v40 = vadd.f32 %v472_v38, %v231_v25  ;;  %v549_v48 = vpop.f32.mrb[4].mxu1  ;;  %v474_v41 = vpop.f32.mrb[5].mxu0  ;;  %1467 = vmatprep.subr.bf16.mxu0 %v1466_v26  ;;  %v1508_v24 = vpack.c.bf16 %v749_v8, %v748_v6  ;;  %v719_v26 = vld [vmem:[#allocation9 + $0x268] sm:$0xff]  ;;  %v721_v38 = vld [vmem:[#allocation9 + $0x278] sm:$0xff] }
 0x163   :  { %v1821_v49 = vadd.f32 %v549_v48, %v239_v30  ;;  %v1823_v47 = vadd.f32 %v474_v41, %v235_v45  ;;  %v551_v50 = vpop.f32.mrb[5].mxu1  ;;  %1499 = vmatprep.subr.bf16.mxu1 %v1498_v31  ;;  %v737_v31 = vld [vmem:[#allocation9 + $0x2f8] sm:$0xff]  ;;  %v1480_v34 = vpack.c.bf16 %v719_v26, %v718_v21  ;;  %v752_v48 = vld [vmem:[#allocation9 + $0x370] sm:$0xff]  ;;  %v1484_v43 = vpack.c.bf16 %v721_v38, %v720_v37 }
 0x164   :  { %v580_v54 = vmul.f32 0.70710677, %v1819_v40  ;;  %v1826_v55 = vadd.f32 %v551_v50, %v243_v35  ;;  %v753_v41 = vld [vmem:[#allocation9 + $0x378] sm:$0xff] }
 0x165   :  { %v582_v58 = vmul.f32 0.70710677, %v1821_v49  ;;  %v581_v59 = vmul.f32 0.70710677, %v1823_v47  ;;  %1469 = vmatpush3.bf16.msra.mxu0 %v1468_v39  ;;  %v478_v1 = vpop.f32.mrb[6].mxu0  ;;  %v1514_v39 = vpack.c.bf16 %v769_v33, %v768_v32  ;;  %v1516_v50 = vpack.c.bf16 %v753_v41, %v752_v48 }
 0x166   :  { %1544 = verf.f32 %v580_v54  ;;  %v583_v63 = vmul.f32 0.70710677, %v1826_v55  ;;  %1501 = vmatpush3.bf16.msra.mxu1 %v1500_v0  ;;  %v555_v2 = vpop.f32.mrb[6].mxu1  ;;  %1471 = vmatprep.subr.bf16.mxu0 %v1470_v42  ;;  %v1831_v7 = vadd.f32 %v478_v1, %v231_v25  ;;  %v480_v10 = vpop.f32.mrb[7].mxu0  ;;  %v1478_v25 = vpack.c.bf16 %v735_v14, %v734_v13  ;;  %v1109_v33 = vld [vmem:[%s1873_s4] ss:$0 sm:$0xff] }
 0x167   :  { %1546 = verf.f32 %v582_v58  ;;  %v1833_v9 = vadd.f32 %v555_v2, %v239_v30  ;;  %v557_v11 = vpop.f32.mrb[7].mxu1  ;;  %1503 = vmatprep.subr.bf16.mxu1 %v1502_v51  ;;  %v1835_v15 = vadd.f32 %v480_v10, %v235_v45  ;;  %v751_v30 = vld [vmem:[#allocation9 + $0x368] sm:$0xff]  ;;  %v736_v45 = vld [vmem:[#allocation9 + $0x2f0] sm:$0xff]  ;;  %v565_v53 = vmul.f32 0.5, %v1823_v47 }
 0x168   :  { %1548 = verf.f32 %v581_v59  ;;  %v1837_v16 = vadd.f32 %v557_v11, %v243_v35  ;;  %v588_v19 = vmul.f32 0.70710677, %v1831_v7  ;;  %v1512_v35 = vpack.c.bf16 %v751_v30, %v750_v27 }
 0x169   :  { %1550 = verf.f32 %v583_v63  ;;  %1473 = vmatpush3.bf16.msra.mxu0 %v1472_v60  ;;  %v590_v22 = vmul.f32 0.70710677, %v1833_v9  ;;  %v589_v23 = vmul.f32 0.70710677, %v1835_v15  ;;  %v1482_v36 = vpack.c.bf16 %v737_v31, %v736_v45 }
 0x16a   :  { %1505 = vmatpush3.bf16.msra.mxu1 %v1504_v3  ;;  %1475 = vmatprep.subr.bf16.mxu0 %v1474_v4  ;;  %1552 = verf.f32 %v588_v19  ;;  %v591_v28 = vmul.f32 0.70710677, %v1837_v16  ;;  %v564_v54 = vmul.f32 0.5, %v1819_v40  ;;  %v567_v56 = vmul.f32 0.5, %v1826_v55 }
 0x16b   :  { %1507 = vmatprep.subr.bf16.mxu1 %v1506_v12  ;;  %1554 = verf.f32 %v590_v22  ;;  %v566_v59 = vmul.f32 0.5, %v1821_v49  ;;  %v573_v40 = vmul.f32 0.5, %v1835_v15  ;;  %v572_v55 = vmul.f32 0.5, %v1831_v7 }
 0x16c   :  { %1556 = verf.f32 %v589_v23  ;;  %v575_v49 = vmul.f32 0.5, %v1837_v16  ;;  %v574_v11 = vmul.f32 0.5, %v1833_v9 }
 0x16d   :  { %1477 = vmatpush3.bf16.msra.mxu0 %v1476_v20  ;;  %1558 = verf.f32 %v591_v28 }
 0x16e   :  { %1509 = vmatpush3.bf16.msra.mxu1 %v1508_v24  ;;  %1479 = vmatprep.subr.bf16.mxu0 %v1478_v25 }
 0x16f   :  { %1511 = vmatprep.subr.bf16.mxu1 %v1510_v29 }
 0x170   :  { %v1545_v0 = vpop.eup %1544 }
 0x171   :  { %v1547_v42 = vpop.eup %1546  ;;  %1481 = vmatpush3.bf16.msra.mxu0 %v1480_v34  ;;  %v612_v46 = vadd.f32 1.0, %v1545_v0 }
 0x172   :  { %v1549_v44 = vpop.eup %1548  ;;  %1513 = vmatpush3.bf16.msra.mxu1 %v1512_v35  ;;  %1483 = vmatprep.subr.bf16.mxu0 %v1482_v36  ;;  %v614_v52 = vadd.f32 1.0, %v1547_v42 }
 0x173   :  { %v1551_v51 = vpop.eup %1550  ;;  %v613_v62 = vadd.f32 1.0, %v1549_v44  ;;  %1515 = vmatprep.subr.bf16.mxu1 %v1514_v39  ;;  %v628_v63 = vmul.f32 %v612_v46, %v564_v54 }
 0x174   :  { %v615_v57 = vadd.f32 1.0, %v1551_v51  ;;  %v1553_v58 = vpop.eup %1552  ;;  %v630_v3 = vmul.f32 %v614_v52, %v566_v59 }
 0x175   :  { %1485 = vmatpush3.bf16.msra.mxu0 %v1484_v43  ;;  %v629_v60 = vmul.f32 %v613_v62, %v565_v53  ;;  %v1555_v61 = vpop.eup %1554  ;;  %v620_v4 = vadd.f32 1.0, %v1553_v58 }
 0x176   :  { %1517 = vmatpush3.bf16.msra.mxu1 %v1516_v50  ;;  %v631_v1 = vmul.f32 %v615_v57, %v567_v56  ;;  %v1557_v2 = vpop.eup %1556  ;;  %v622_v5 = vadd.f32 1.0, %v1555_v61 }
 0x177   :  { %984 = vmatprep.mubr.f32.mxu0 %v629_v60  ;;  %v1559_v47 = vpop.eup %1558  ;;  %v621_v6 = vadd.f32 1.0, %v1557_v2  ;;  %v636_v13 = vmul.f32 %v620_v4, %v572_v55 }
 0x178   :  { %1059 = vmatprep.mubr.f32.mxu1 %v631_v1  ;;  %985 = vmatmul.mubr.f32.vlgmr.msra.gmra.mrb[12].mxu0 %v628_v63  ;;  %v623_v10 = vadd.f32 1.0, %v1559_v47  ;;  %v638_v14 = vmul.f32 %v622_v5, %v574_v11 }
 0x179   :  { %1060 = vmatmul.mubr.f32.vlgmr.msra.gmra.mrb[12].mxu1 %v630_v3  ;;  %v637_v12 = vmul.f32 %v621_v6, %v573_v40 }
 0x17a   :  { %v639_v8 = vmul.f32 %v623_v10, %v575_v49 }
 0x17b   :  { %989 = vmatprep.mubr.f32.mxu0 %v637_v12 }
 0x17c   :  { %1064 = vmatprep.mubr.f32.mxu1 %v639_v8  ;;  %990 = vmatmul.mubr.f32.gmra.mrb[14].mxu0 %v636_v13 }
 0x17d   :  { %1065 = vmatmul.mubr.f32.gmra.mrb[14].mxu1 %v638_v14 }
 0x22b   :  { %v1142_v15 = vpop.f32.mrb[8].mxu0 }
 0x22c   :  { %v1180_v17 = vpop.f32.mrb[8].mxu1  ;;  %v1143_v18 = vpop.f32.mrb[9].mxu0 }
 0x22d   :  { %v1144_v19 = vadd.f32 %v1143_v18, %v1142_v15  ;;  %v1181_v20 = vpop.f32.mrb[9].mxu1 }
 0x22e   :  { %v1182_v7 = vadd.f32 %v1181_v20, %v1180_v17 }
 0x22f   :  { %v1145_v16 = vpop.f32.mrb[10].mxu0 }
 0x230   :  { %v912_v21 = vadd.f32 %v1182_v7, %v1144_v19  ;;  %v1183_v22 = vpop.f32.mrb[10].mxu1  ;;  %v1146_v23 = vpop.f32.mrb[11].mxu0 }
 0x231   :  { %v1147_v24 = vadd.f32 %v1146_v23, %v1145_v16  ;;  %v1184_v9 = vpop.f32.mrb[11].mxu1 }
 0x232   :  { %v1185_v25 = vadd.f32 %v1184_v9, %v1183_v22 }
 0x234   :  { %v917_v26 = vadd.f32 %v1185_v25, %v1147_v24 }
 0x24b   :  { %v1218_v27 = vpop.f32.mrb[12].mxu0 }
 0x24c   :  { %v1256_v28 = vpop.f32.mrb[12].mxu1  ;;  %v1219_v29 = vpop.f32.mrb[13].mxu0 }
 0x24d   :  { %v1220_v30 = vadd.f32 %v1219_v29, %v1218_v27  ;;  %v1257_v45 = vpop.f32.mrb[13].mxu1 }
 0x24e   :  { %v1258_v31 = vadd.f32 %v1257_v45, %v1256_v28 }
 0x24f   :  { %v987_v32 = vadd.f32 %v1220_v30, %v912_v21  ;;  %v1221_v34 = vpop.f32.mrb[14].mxu0 }
 0x250   :  { %v1259_v36 = vpop.f32.mrb[14].mxu1  ;;  %v1222_v37 = vpop.f32.mrb[15].mxu0 }
 0x251   :  { %v1062_v35 = vadd.f32 %v1258_v31, %v987_v32  ;;  %v1223_v38 = vadd.f32 %v1222_v37, %v1221_v34  ;;  %v1260_v39 = vpop.f32.mrb[15].mxu1 }
 0x252   :  { %v1261_v41 = vadd.f32 %v1260_v39, %v1259_v36 }
 0x253   :  { %v1086_v48 = vadd.f32 %v1109_v33, %v1062_v35  ;;  %v992_v0 = vadd.f32 %v1223_v38, %v917_v26 }
 0x255   :  { %1088 = vst [vmem:[#allocation11] sm:$0xff] %v1086_v48  ;;  %v1067_v42 = vadd.f32 %v1261_v41, %v992_v0 }
 0x257   :  { %v1087_v43 = vadd.f32 %v1109_v33, %v1067_v42 }
 0x259   :  { %1089 = vst [vmem:[#allocation11 + $0x8] sm:$0xff] %v1087_v43 }
 0x25a   :  { %1659 = shalt.err (!%p1656_p8)
}
 0x25b   :  { %s1660_s23 = scalar_lea.hbm %s1874_s5, 256 }
 0x25c   :  { %p1661_p9 = scmp.ne.s32.totalorder %s1874_s5, %s1660_s23  ;;  %p1664_p10 = scmp.lt.u32.totalorder %s1660_s23, %s1874_s5 }
 0x25e   :  { %p1666_p11 = pnand %p1664_p10, %p1661_p9 }
 0x260   :  { %1669 = shalt.err (!%p1666_p11)
}
 0x261   :  { %1101 = dma.vmem_to_hbm [thread:$0]  %s1096_s20, 256, %s1874_s5, [#allocation5], %s1682_s1, %s1682_s1, %s1683_s17  }
 0x262   :  { %1676 = dma.done.wait [#allocation5], 256  }
 0x263   :  { %1677 = vsyncadd [#allocation5], 4294967040 }
 0x264   :  { %1105 = vsyncpa [#allocation4], 1 }
 0x265   :  { %1106 = vsyncpa [#allocation7], 1 }
 0x266   :  { %1107 = vsyncpa [#allocation10], 1 }
 0x267   :  { %1108 = vsyncpa [#allocation5], 1 }

</bundles_post_ra>
